<compile_context>
chip_gen: v7x
topology: tpu7x:2x2x1
jax: 0.10.0
libtpu: 0.0.40
codegen_flags: <defaults>
</compile_context>

<pallas_src>
from functools import lru_cache

import jax
import jax.numpy as jnp
from jax import lax
from jax.experimental import pallas as pl
from jax.experimental.pallas import tpu as pltpu


_LANES = 128
_ROW_CHUNK = 16                        # sublane rows per inner loop step
_MAX_ROW_BLOCK = 1024                  # cap on rows per grid step
_MAX_BATCH_BLOCK = 8                   # cap on batch elems per grid step (static)
_TARGET_STEP_BYTES = 5 * 1024 * 1024   # ~5 MiB of planes moved per grid step
_VMEM_LIMIT_BYTES = 32 * 1024 * 1024   # fits scoped VMEM on v5e / v6e / v7x


def _calc_img_size(HW, c, d):
    """round((HW//c) ** (1/d)) like the torch code, but fail loudly if wrong."""
    img_sz = int(round((HW // c) ** (1.0 / d)))
    if img_sz <= 0 or c * img_sz ** d != HW:
        raise ValueError(
            f"x with {HW} features is not a {c}-channel {d}-D grid")
    return img_sz


def _make_skip_kernel(n_cx, n_cg, tb, t_rows):
    """out[b,co] = tanh(b'[co] + sum_ci W[co,ci]*x[b,ci] + sum_cj W[co,n_cx+cj]*g[b,cj])."""
    total = n_cx + n_cg
    n_full = t_rows // _ROW_CHUNK
    tail = t_rows - n_full * _ROW_CHUNK

    def kernel(w_ref, b_ref, x_ref, g_ref, o_ref):
        # w_ref: (n_cx, n_cx+n_cg) f32 SMEM ; b_ref: (n_cx,) f32 SMEM
        # x_ref: (tb, n_cx, t_rows, 128) ; g_ref: (tb, n_cg, t_rows, 128)
        # o_ref: (tb, n_cx, t_rows, 128)
        #
        # Hoist all SMEM scalar reads out of the chunk loops (JAX does not CSE
        # them; re-reading per chunk wastes scalar-slot bundles).
        w = [[w_ref[co, c] for c in range(total)] for co in range(n_cx)]
        bias = [b_ref[co] for co in range(n_cx)]

        def do_chunk(bi, off, rb):
            sl = pl.ds(off, rb)
            xs = [x_ref[bi, ci, sl, :].astype(jnp.float32) for ci in range(n_cx)]
            gs = [g_ref[bi, cj, sl, :].astype(jnp.float32) for cj in range(n_cg)]
            for co in range(n_cx):
                acc = xs[0] * w[co][0]
                for ci in range(1, n_cx):
                    acc = acc + xs[ci] * w[co][ci]
                for cj in range(n_cg):
                    acc = acc + gs[cj] * w[co][n_cx + cj]
                acc = acc + bias[co]
                o_ref[bi, co, sl, :] = jnp.tanh(acc).astype(o_ref.dtype)

        # TODO(synk): for very large batch with tiny images tb is capped at 8
        # (static unroll); a dynamic-batch fori_loop would amortize further.
        for bi in range(tb):                 # static: tb <= _MAX_BATCH_BLOCK
            if n_full > 0:
                def body(ch, carry, bi=bi):  # fori_loop bounds vreg live ranges
                    off = pl.multiple_of(ch * _ROW_CHUNK, _ROW_CHUNK)
                    do_chunk(bi, off, _ROW_CHUNK)
                    return carry
                lax.fori_loop(0, n_full, body, 0, unroll=min(2, n_full))
            if tail > 0:                     # one aligned-start tail chunk
                do_chunk(bi, n_full * _ROW_CHUNK, tail)

    return kernel


@lru_cache(maxsize=None)
def _build_skip_call(batch, n_cx, n_cg, rows, tb, t_rows, n_batch_blk,
                     n_row_blk, dtype_name):
    dtype = jnp.dtype(dtype_name)
    sp = rows * _LANES
    cost = pl.CostEstimate(
        flops=2 * batch * sp * n_cx * (n_cx + n_cg + 1),
        transcendentals=batch * sp * n_cx,
        bytes_accessed=dtype.itemsize * batch * sp * (2 * n_cx + n_cg),
    )
    idx = lambda i, j: (i, 0, j, 0)
    return pl.pallas_call(
        _make_skip_kernel(n_cx, n_cg, tb, t_rows),
        out_shape=jax.ShapeDtypeStruct((batch, n_cx, rows, _LANES), dtype),
        grid=(n_batch_blk, n_row_blk),
        in_specs=[
            pl.BlockSpec(memory_space=pltpu.MemorySpace.SMEM),   # folded weights
            pl.BlockSpec(memory_space=pltpu.MemorySpace.SMEM),   # folded bias
            pl.BlockSpec((tb, n_cx, t_rows, _LANES), idx),       # x planes
            pl.BlockSpec((tb, n_cg, t_rows, _LANES), idx),       # g planes
        ],
        out_specs=pl.BlockSpec((tb, n_cx, t_rows, _LANES), idx),
        compiler_params=pltpu.CompilerParams(
            dimension_semantics=("parallel", "parallel"),
            vmem_limit_bytes=_VMEM_LIMIT_BYTES),
        cost_estimate=cost,
    )


class ScaleLayerPallas:
    """Pallas-TPU port of ScaleLayer's forward pass (1x1-conv skip branch)."""

    def __init__(self, hidden_sz, out_dim, imgDims, nb_fcn, ksz, stride, h,
                 pad=0, skip_grad=False, key=None):
        self.hidden_sz = hidden_sz
        self.out = out_dim
        self.imgDims = imgDims
        self.nb_fcn = nb_fcn
        self.ksz = ksz
        self.stride = stride
        self.pad = pad
        self.skip_grad = skip_grad
        self.h = jnp.asarray(h)[..., None, None]      # kept; unused in forward
        if skip_grad:
            if key is None:
                key = jax.random.PRNGKey(0)
            k1, k2 = jax.random.split(key)
            c, cg = imgDims, nb_fcn * imgDims
            # conv1: (out=imgDims, in=nb_fcn*imgDims, 1x1), normal(0, 0.01), b=0
            self.w1 = 0.01 * jax.random.normal(k1, (c, cg), jnp.float32)
            self.b1 = jnp.zeros((c,), jnp.float32)
            # conv2: (out=imgDims, in=2*imgDims, 1x1), normal(0, 0.01), b=0
            self.w2 = 0.01 * jax.random.normal(k2, (c, 2 * c), jnp.float32)
            self.b2 = jnp.zeros((c,), jnp.float32)
            # Fold conv1 into conv2 once (exact linear composition):
            #   conv2(cat(x, conv1(g))) = W2x.x + (W2g.W1).g + (W2g.b1 + b2)
            w2x, w2g = self.w2[:, :c], self.w2[:, c:]
            w2g_w1 = jnp.dot(w2g, self.w1, precision=lax.Precision.HIGHEST)
            self.w_fold = jnp.concatenate([w2x, w2g_w1], axis=1)   # (C, C+CG)
            self.b_fold = w2g @ self.b1 + self.b2                  # (C,)

    def skip_connection(self, x, g):
        B, HW = x.shape
        c, cg = self.imgDims, self.nb_fcn * self.imgDims
        img_sz = _calc_img_size(HW, c, self.imgDims)
        sp = img_sz ** self.imgDims
        dtype = jnp.dtype(x.dtype)

        # --- lane padding: spatial lives on (rows, 128) so every load/store is
        # lane-dense; pad to a multiple of 128 when needed, slice off below.
        sp_pad = -(-sp // _LANES) * _LANES
        rows = sp_pad // _LANES
        x3 = x.reshape(B, c, sp)
        g3 = g.reshape(B, cg, sp)
        if sp_pad != sp:
            pad = ((0, 0), (0, 0), (0, sp_pad - sp))
            x3 = jnp.pad(x3, pad)
            g3 = jnp.pad(g3, pad)
        x4 = x3.reshape(B, c, rows, _LANES)
        g4 = g3.reshape(B, cg, rows, _LANES)

        # --- tile sizing: ~5 MiB of planes per grid step (double-buffered
        # ~10 MiB -> inside scoped VMEM on v5e/v6e/v7x).
        streams = 2 * c + cg                       # x read + out write + g read
        row_bytes = streams * _LANES * dtype.itemsize
        cap = max(_ROW_CHUNK,
                  min(_MAX_ROW_BLOCK,
                      (_TARGET_STEP_BYTES // row_bytes) // _ROW_CHUNK * _ROW_CHUNK))
        if rows <= cap:
            t_rows, n_row_blk = rows, 1
            # Small images: pack several batch elements per step to amortize
            # the fixed per-step overhead.
            tb = int(max(1, min(B, _MAX_BATCH_BLOCK,
                                _TARGET_STEP_BYTES // max(1, rows * row_bytes))))
        else:
            t_rows, n_row_blk = cap, pl.cdiv(rows, cap)
            tb = 1
        n_batch_blk = pl.cdiv(B, tb)

        # v7x has 2 TensorCores: keep >= 2 parallel grid steps when possible.
        if n_batch_blk * n_row_blk < 2:
            if B > 1:
                tb = min(tb, -(-B // 2))
                n_batch_blk = pl.cdiv(B, tb)
            elif rows >= 2 * _ROW_CHUNK:
                half = -(-rows // 2)
                t_rows = -(-half // _ROW_CHUNK) * _ROW_CHUNK
                n_row_blk = pl.cdiv(rows, t_rows)

        call = _build_skip_call(B, c, cg, rows, tb, t_rows, n_batch_blk,
                                n_row_blk, dtype.name)
        out4 = call(self.w_fold, self.b_fold, x4, g4)
        out = out4.reshape(B, c, sp_pad)
        if sp_pad != sp:
            out = out[:, :, :sp]
        return out.reshape(B, c * sp)      # == torch flatten(-(imgDims+1), -1)

    def forward(self, x, *args):
        if len(args) > 0 and self.skip_grad:
            return self.skip_connection(x, args[0])
        return x

    __call__ = forward


def _reference(layer, x, g):
    """Pure-JAX unfused reference: conv1 -> cat -> conv2 -> tanh, NCHW layout."""
    B, HW = x.shape
    C = layer.imgDims
    CG = layer.nb_fcn * layer.imgDims
    S = _calc_img_size(HW, C, layer.imgDims)
    sp_shape = (S,) * layer.imgDims
    bshape = (1, -1) + (1,) * layer.imgDims
    hi = lax.Precision.HIGHEST
    x4 = x.reshape((B, C) + sp_shape)
    g4 = g.reshape((B, CG) + sp_shape)
    g1 = jnp.einsum("oc,bc...->bo...", layer.w1, g4, precision=hi) \
        + layer.b1.reshape(bshape)
    cat = jnp.concatenate([x4, g1], axis=1)
    out = jnp.tanh(jnp.einsum("oc,bc...->bo...", layer.w2, cat, precision=hi)
                   + layer.b2.reshape(bshape))
    return out.reshape(B, C * S ** layer.imgDims)


if __name__ == "__main__":
    key = jax.random.PRNGKey(0)
    k_x1, k_g1, k_w1, k_x2, k_g2, k_x3, k_g3, k_w3 = jax.random.split(key, 8)

    # --- case 1: 16x16 images, imgDims=2, nb_fcn=3 ---------------------------
    B, imgDims, nb_fcn, S = 2, 2, 3, 16
    HW = imgDims * S * S                              # x: (B, imgDims * S*S)
    x = jax.random.normal(k_x1, (B, HW), jnp.float32)
    g = jax.random.normal(k_g1, (B, nb_fcn * imgDims * S * S), jnp.float32)
    h = jnp.ones((imgDims,), jnp.float32)
    layer = ScaleLayerPallas(hidden_sz=32, out_dim=HW, imgDims=imgDims,
                             nb_fcn=nb_fcn, ksz=1, stride=1, h=h,
                             pad=0, skip_grad=True, key=k_w1)
    out = jax.block_until_ready(layer(x, g))
    assert out.shape == (B, HW)
    ref = _reference(layer, x, g)
    assert jnp.allclose(out, ref, atol=1e-5, rtol=1e-5), \
        float(jnp.max(jnp.abs(out - ref)))

    # --- case 2: odd spatial (10x10) exercises the lane-padding path ---------
    S2 = 10
    HW2 = imgDims * S2 * S2
    x2 = jax.random.normal(k_x2, (B, HW2), jnp.float32)
    g2 = jax.random.normal(k_g2, (B, nb_fcn * imgDims * S2 * S2), jnp.float32)
    out2 = jax.block_until_ready(layer(x2, g2))
    assert out2.shape == (B, HW2)
    ref2 = _reference(layer, x2, g2)
    assert jnp.allclose(out2, ref2, atol=1e-5, rtol=1e-5), \
        float(jnp.max(jnp.abs(out2 - ref2)))

    # --- case 3: 64x64 images, B=5 -> batch-blocked grid + fori row chunks ---
    B3, nb_fcn3, S3 = 5, 1, 64
    HW3 = imgDims * S3 * S3
    x3 = jax.random.normal(k_x3, (B3, HW3), jnp.float32)
    g3 = jax.random.normal(k_g3, (B3, nb_fcn3 * imgDims * S3 * S3), jnp.float32)
    layer3 = ScaleLayerPallas(hidden_sz=32, out_dim=HW3, imgDims=imgDims,
                              nb_fcn=nb_fcn3, ksz=1, stride=1, h=h,
                              pad=0, skip_grad=True, key=k_w3)
    out3 = jax.block_until_ready(layer3(x3, g3))
    assert out3.shape == (B3, HW3)
    ref3 = _reference(layer3, x3, g3)
    assert jnp.allclose(out3, ref3, atol=1e-5, rtol=1e-5), \
        float(jnp.max(jnp.abs(out3 - ref3)))

    # --- identity path (no extra args) ----------------------------------------
    out_id = jax.block_until_ready(layer(x))
    assert jnp.array_equal(out_id, x)

    print("KERNEL_OK")
</pallas_src>

<mosaic_0001>
module attributes {stable_mosaic.version = 11 : i64} {
  func.func @kernel(%arg0: i32, %arg1: i32, %arg2: memref<2x8xf32, #tpu.memory_space<smem>>, %arg3: memref<2xf32, #tpu.memory_space<smem>>, %arg4: memref<1x2x2x128xf32, #tpu.memory_space<vmem>>, %arg5: memref<1x6x2x128xf32, #tpu.memory_space<vmem>>, %arg6: memref<1x2x2x128xf32, #tpu.memory_space<vmem>>) attributes {dimension_semantics = [#tpu.dimension_semantics<parallel>, #tpu.dimension_semantics<parallel>], iteration_bounds = array<i64: 2, 1>, scalar_prefetch = 0 : i64, scratch_operands = 0 : i64, tpu.core_type = #tpu.core_type<tc>, window_params = [{transform_indices = @transform_0, window_bounds = array<i64: 2, 8>}, {transform_indices = @transform_1, window_bounds = array<i64: 2>}, {transform_indices = @transform_2, window_bounds = array<i64: 1, 2, 2, 128>}, {transform_indices = @transform_3, window_bounds = array<i64: 1, 6, 2, 128>}, {transform_indices = @transform_4, window_bounds = array<i64: 1, 2, 2, 128>}]} {
    %c0 = arith.constant 0 : index
    %c0_0 = arith.constant 0 : index
    %0 = memref.load %arg2[%c0, %c0_0] : memref<2x8xf32, #tpu.memory_space<smem>>
    %c0_1 = arith.constant 0 : index
    %c1 = arith.constant 1 : index
    %1 = memref.load %arg2[%c0_1, %c1] : memref<2x8xf32, #tpu.memory_space<smem>>
    %c0_2 = arith.constant 0 : index
    %c2 = arith.constant 2 : index
    %2 = memref.load %arg2[%c0_2, %c2] : memref<2x8xf32, #tpu.memory_space<smem>>
    %c0_3 = arith.constant 0 : index
    %c3 = arith.constant 3 : index
    %3 = memref.load %arg2[%c0_3, %c3] : memref<2x8xf32, #tpu.memory_space<smem>>
    %c0_4 = arith.constant 0 : index
    %c4 = arith.constant 4 : index
    %4 = memref.load %arg2[%c0_4, %c4] : memref<2x8xf32, #tpu.memory_space<smem>>
    %c0_5 = arith.constant 0 : index
    %c5 = arith.constant 5 : index
    %5 = memref.load %arg2[%c0_5, %c5] : memref<2x8xf32, #tpu.memory_space<smem>>
    %c0_6 = arith.constant 0 : index
    %c6 = arith.constant 6 : index
    %6 = memref.load %arg2[%c0_6, %c6] : memref<2x8xf32, #tpu.memory_space<smem>>
    %c0_7 = arith.constant 0 : index
    %c7 = arith.constant 7 : index
    %7 = memref.load %arg2[%c0_7, %c7] : memref<2x8xf32, #tpu.memory_space<smem>>
    %c1_8 = arith.constant 1 : index
    %c0_9 = arith.constant 0 : index
    %8 = memref.load %arg2[%c1_8, %c0_9] : memref<2x8xf32, #tpu.memory_space<smem>>
    %c1_10 = arith.constant 1 : index
    %c1_11 = arith.constant 1 : index
    %9 = memref.load %arg2[%c1_10, %c1_11] : memref<2x8xf32, #tpu.memory_space<smem>>
    %c1_12 = arith.constant 1 : index
    %c2_13 = arith.constant 2 : index
    %10 = memref.load %arg2[%c1_12, %c2_13] : memref<2x8xf32, #tpu.memory_space<smem>>
    %c1_14 = arith.constant 1 : index
    %c3_15 = arith.constant 3 : index
    %11 = memref.load %arg2[%c1_14, %c3_15] : memref<2x8xf32, #tpu.memory_space<smem>>
    %c1_16 = arith.constant 1 : index
    %c4_17 = arith.constant 4 : index
    %12 = memref.load %arg2[%c1_16, %c4_17] : memref<2x8xf32, #tpu.memory_space<smem>>
    %c1_18 = arith.constant 1 : index
    %c5_19 = arith.constant 5 : index
    %13 = memref.load %arg2[%c1_18, %c5_19] : memref<2x8xf32, #tpu.memory_space<smem>>
    %c1_20 = arith.constant 1 : index
    %c6_21 = arith.constant 6 : index
    %14 = memref.load %arg2[%c1_20, %c6_21] : memref<2x8xf32, #tpu.memory_space<smem>>
    %c1_22 = arith.constant 1 : index
    %c7_23 = arith.constant 7 : index
    %15 = memref.load %arg2[%c1_22, %c7_23] : memref<2x8xf32, #tpu.memory_space<smem>>
    %c0_24 = arith.constant 0 : index
    %16 = memref.load %arg3[%c0_24] : memref<2xf32, #tpu.memory_space<smem>>
    %c1_25 = arith.constant 1 : index
    %17 = memref.load %arg3[%c1_25] : memref<2xf32, #tpu.memory_space<smem>>
    %c0_26 = arith.constant 0 : index
    %c0_27 = arith.constant 0 : index
    %c0_28 = arith.constant 0 : index
    %c0_29 = arith.constant 0 : index
    %18 = vector.load %arg4[%c0_26, %c0_27, %c0_28, %c0_29] : memref<1x2x2x128xf32, #tpu.memory_space<vmem>>, vector<1x1x2x128xf32>
    %19 = vector.shape_cast %18 : vector<1x1x2x128xf32> to vector<2x128xf32>
    %c0_30 = arith.constant 0 : index
    %c1_31 = arith.constant 1 : index
    %c0_32 = arith.constant 0 : index
    %c0_33 = arith.constant 0 : index
    %20 = vector.load %arg4[%c0_30, %c1_31, %c0_32, %c0_33] : memref<1x2x2x128xf32, #tpu.memory_space<vmem>>, vector<1x1x2x128xf32>
    %21 = vector.shape_cast %20 : vector<1x1x2x128xf32> to vector<2x128xf32>
    %c0_34 = arith.constant 0 : index
    %c0_35 = arith.constant 0 : index
    %c0_36 = arith.constant 0 : index
    %c0_37 = arith.constant 0 : index
    %22 = vector.load %arg5[%c0_34, %c0_35, %c0_36, %c0_37] : memref<1x6x2x128xf32, #tpu.memory_space<vmem>>, vector<1x1x2x128xf32>
    %23 = vector.shape_cast %22 : vector<1x1x2x128xf32> to vector<2x128xf32>
    %c0_38 = arith.constant 0 : index
    %c1_39 = arith.constant 1 : index
    %c0_40 = arith.constant 0 : index
    %c0_41 = arith.constant 0 : index
    %24 = vector.load %arg5[%c0_38, %c1_39, %c0_40, %c0_41] : memref<1x6x2x128xf32, #tpu.memory_space<vmem>>, vector<1x1x2x128xf32>
    %25 = vector.shape_cast %24 : vector<1x1x2x128xf32> to vector<2x128xf32>
    %c0_42 = arith.constant 0 : index
    %c2_43 = arith.constant 2 : index
    %c0_44 = arith.constant 0 : index
    %c0_45 = arith.constant 0 : index
    %26 = vector.load %arg5[%c0_42, %c2_43, %c0_44, %c0_45] : memref<1x6x2x128xf32, #tpu.memory_space<vmem>>, vector<1x1x2x128xf32>
    %27 = vector.shape_cast %26 : vector<1x1x2x128xf32> to vector<2x128xf32>
    %c0_46 = arith.constant 0 : index
    %c3_47 = arith.constant 3 : index
    %c0_48 = arith.constant 0 : index
    %c0_49 = arith.constant 0 : index
    %28 = vector.load %arg5[%c0_46, %c3_47, %c0_48, %c0_49] : memref<1x6x2x128xf32, #tpu.memory_space<vmem>>, vector<1x1x2x128xf32>
    %29 = vector.shape_cast %28 : vector<1x1x2x128xf32> to vector<2x128xf32>
    %c0_50 = arith.constant 0 : index
    %c4_51 = arith.constant 4 : index
    %c0_52 = arith.constant 0 : index
    %c0_53 = arith.constant 0 : index
    %30 = vector.load %arg5[%c0_50, %c4_51, %c0_52, %c0_53] : memref<1x6x2x128xf32, #tpu.memory_space<vmem>>, vector<1x1x2x128xf32>
    %31 = vector.shape_cast %30 : vector<1x1x2x128xf32> to vector<2x128xf32>
    %c0_54 = arith.constant 0 : index
    %c5_55 = arith.constant 5 : index
    %c0_56 = arith.constant 0 : index
    %c0_57 = arith.constant 0 : index
    %32 = vector.load %arg5[%c0_54, %c5_55, %c0_56, %c0_57] : memref<1x6x2x128xf32, #tpu.memory_space<vmem>>, vector<1x1x2x128xf32>
    %33 = vector.shape_cast %32 : vector<1x1x2x128xf32> to vector<2x128xf32>
    %34 = vector.broadcast %0 : f32 to vector<2x128xf32>
    %35 = arith.mulf %19, %34 : vector<2x128xf32>
    %36 = vector.broadcast %1 : f32 to vector<2x128xf32>
    %37 = arith.mulf %21, %36 : vector<2x128xf32>
    %38 = arith.addf %35, %37 : vector<2x128xf32>
    %39 = vector.broadcast %2 : f32 to vector<2x128xf32>
    %40 = arith.mulf %23, %39 : vector<2x128xf32>
    %41 = arith.addf %38, %40 : vector<2x128xf32>
    %42 = vector.broadcast %3 : f32 to vector<2x128xf32>
    %43 = arith.mulf %25, %42 : vector<2x128xf32>
    %44 = arith.addf %41, %43 : vector<2x128xf32>
    %45 = vector.broadcast %4 : f32 to vector<2x128xf32>
    %46 = arith.mulf %27, %45 : vector<2x128xf32>
    %47 = arith.addf %44, %46 : vector<2x128xf32>
    %48 = vector.broadcast %5 : f32 to vector<2x128xf32>
    %49 = arith.mulf %29, %48 : vector<2x128xf32>
    %50 = arith.addf %47, %49 : vector<2x128xf32>
    %51 = vector.broadcast %6 : f32 to vector<2x128xf32>
    %52 = arith.mulf %31, %51 : vector<2x128xf32>
    %53 = arith.addf %50, %52 : vector<2x128xf32>
    %54 = vector.broadcast %7 : f32 to vector<2x128xf32>
    %55 = arith.mulf %33, %54 : vector<2x128xf32>
    %56 = arith.addf %53, %55 : vector<2x128xf32>
    %57 = vector.broadcast %16 : f32 to vector<2x128xf32>
    %58 = arith.addf %56, %57 : vector<2x128xf32>
    %59 = math.tanh %58 : vector<2x128xf32>
    %c0_58 = arith.constant 0 : index
    %c0_59 = arith.constant 0 : index
    %c0_60 = arith.constant 0 : index
    %c0_61 = arith.constant 0 : index
    %60 = vector.load %arg6[%c0_58, %c0_59, %c0_60, %c0_61] : memref<1x2x2x128xf32, #tpu.memory_space<vmem>>, vector<1x1x2x128xf32>
    %61 = vector.shape_cast %60 : vector<1x1x2x128xf32> to vector<2x128xf32>
    %62 = vector.shape_cast %59 : vector<2x128xf32> to vector<1x1x2x128xf32>
    tpu.vector_store %arg6[%c0_58, %c0_59, %c0_60, %c0_61], %62 {strides = array<i32>} : memref<1x2x2x128xf32, #tpu.memory_space<vmem>>, vector<1x1x2x128xf32>,
    %63 = vector.broadcast %8 : f32 to vector<2x128xf32>
    %64 = arith.mulf %19, %63 : vector<2x128xf32>
    %65 = vector.broadcast %9 : f32 to vector<2x128xf32>
    %66 = arith.mulf %21, %65 : vector<2x128xf32>
    %67 = arith.addf %64, %66 : vector<2x128xf32>
    %68 = vector.broadcast %10 : f32 to vector<2x128xf32>
    %69 = arith.mulf %23, %68 : vector<2x128xf32>
    %70 = arith.addf %67, %69 : vector<2x128xf32>
    %71 = vector.broadcast %11 : f32 to vector<2x128xf32>
    %72 = arith.mulf %25, %71 : vector<2x128xf32>
    %73 = arith.addf %70, %72 : vector<2x128xf32>
    %74 = vector.broadcast %12 : f32 to vector<2x128xf32>
    %75 = arith.mulf %27, %74 : vector<2x128xf32>
    %76 = arith.addf %73, %75 : vector<2x128xf32>
    %77 = vector.broadcast %13 : f32 to vector<2x128xf32>
    %78 = arith.mulf %29, %77 : vector<2x128xf32>
    %79 = arith.addf %76, %78 : vector<2x128xf32>
    %80 = vector.broadcast %14 : f32 to vector<2x128xf32>
    %81 = arith.mulf %31, %80 : vector<2x128xf32>
    %82 = arith.addf %79, %81 : vector<2x128xf32>
    %83 = vector.broadcast %15 : f32 to vector<2x128xf32>
    %84 = arith.mulf %33, %83 : vector<2x128xf32>
    %85 = arith.addf %82, %84 : vector<2x128xf32>
    %86 = vector.broadcast %17 : f32 to vector<2x128xf32>
    %87 = arith.addf %85, %86 : vector<2x128xf32>
    %88 = math.tanh %87 : vector<2x128xf32>
    %c0_62 = arith.constant 0 : index
    %c1_63 = arith.constant 1 : index
    %c0_64 = arith.constant 0 : index
    %c0_65 = arith.constant 0 : index
    %89 = vector.load %arg6[%c0_62, %c1_63, %c0_64, %c0_65] : memref<1x2x2x128xf32, #tpu.memory_space<vmem>>, vector<1x1x2x128xf32>
    %90 = vector.shape_cast %89 : vector<1x1x2x128xf32> to vector<2x128xf32>
    %91 = vector.shape_cast %88 : vector<2x128xf32> to vector<1x1x2x128xf32>
    tpu.vector_store %arg6[%c0_62, %c1_63, %c0_64, %c0_65], %91 {strides = array<i32>} : memref<1x2x2x128xf32, #tpu.memory_space<vmem>>, vector<1x1x2x128xf32>,
    return
  }
  func.func @transform_0(%arg0: i32, %arg1: i32) -> (i32, i32) {
    %c0_i32 = arith.constant 0 : i32
    %c0_i32_0 = arith.constant 0 : i32
    %c0_i32_1 = arith.constant 0 : i32
    return %c0_i32, %c0_i32_0 : i32, i32
  }
  func.func @transform_1(%arg0: i32, %arg1: i32) -> i32 {
    %c0_i32 = arith.constant 0 : i32
    %c0_i32_0 = arith.constant 0 : i32
    return %c0_i32 : i32
  }
  func.func @transform_2(%arg0: i32, %arg1: i32) -> (i32, i32, i32, i32) {
    %c0_i32 = arith.constant 0 : i32
    %c0_i32_0 = arith.constant 0 : i32
    %c0_i32_1 = arith.constant 0 : i32
    return %arg0, %c0_i32, %arg1, %c0_i32_0 : i32, i32, i32, i32
  }
  func.func @transform_3(%arg0: i32, %arg1: i32) -> (i32, i32, i32, i32) {
    %c0_i32 = arith.constant 0 : i32
    %c0_i32_0 = arith.constant 0 : i32
    %c0_i32_1 = arith.constant 0 : i32
    return %arg0, %c0_i32, %arg1, %c0_i32_0 : i32, i32, i32, i32
  }
  func.func @transform_4(%arg0: i32, %arg1: i32) -> (i32, i32, i32, i32) {
    %c0_i32 = arith.constant 0 : i32
    %c0_i32_0 = arith.constant 0 : i32
    %c0_i32_1 = arith.constant 0 : i32
    return %arg0, %c0_i32, %arg1, %c0_i32_0 : i32, i32, i32, i32
  }
}

</mosaic_0001>

<bundles_post_ra>
// kernel: tpu_custom_call.1
= control target key start
LH: loop header
LB: loop body
LE: loop exit
PB: predicated region body
PF: predicated region fallthrough
CT: control target
= control target key end

     0   :  { %s1206_s0 = inlined_call_operand.hbm [shape: f32[2,8], index: 0, kind: input, shape index: {}]   ;;  %s1207_s1 = inlined_call_operand.vmem [shape: f32[2], index: 1, kind: input, shape index: {}]   ;;  %s1208_s2 = inlined_call_operand.hbm [shape: f32[2,2,2,128], index: 2, kind: input, shape index: {}]   ;;  %s1209_s3 = inlined_call_operand.hbm [shape: f32[2,6,2,128], index: 3, kind: input, shape index: {}]   ;;  %s1210_s4 = inlined_call_operand.hbm [shape: f32[2,2,2,128], index: 4, kind: output, shape index: {}]  }
   0x1   :  { %1215 = sst [smem:[#allocation17_spill]] %s1206_s0 }
   0x2   :  { %1216 = sst [smem:[#allocation18_spill]] %s1207_s1 }
   0x3   :  { %1217 = sst [smem:[#allocation19_spill]] %s1208_s2 }
   0x4   :  { %9 = vsyncpa [#allocation5], 0 }
   0x5   :  { %10 = vsyncpa [#allocation6], 0 }
   0x6   :  { %11 = vsyncpa [#allocation3], 0 }
   0x7   :  { %13 = vsyncpa [#allocation3 + $0x1], 0 }
   0x8   :  { %14 = vsyncpa [#allocation10], 0 }
   0x9   :  { %16 = vsyncpa [#allocation10 + $0x1], 0 }
   0xa   :  { %17 = vsyncpa [#allocation4], 0 }
   0xb   :  { %19 = vsyncpa [#allocation4 + $0x1], 0  ;;  %s899_s15 = smov 0   ;;  %s901_s16 = smov 0  }
   0xc   :  { %s903_s17 = smov 0   ;;  %s905_s18 = smov 0  }
   0xd   :  { %s907_s19 = smov 0   ;;  %s909_s20 = smov 0  }
   0xe LB: > { %s537_s21 = sadd.s32 4294967295, %s863_s20   ;;  %s538_s22 = sadd.s32 4294967294, %s863_s20   ;;  %s863_s20 = sphi %s909_s20, %s25_s20   ;;  %s859_s19 = sphi %s907_s19, %s1237_s19   ;;  %s855_s18 = sphi %s905_s18, %s1236_s18   ;;  %s851_s17 = sphi %s903_s17, %s1235_s17   ;;  %s847_s16 = sphi %s901_s16, %s1234_s16   ;;  %s843_s15 = sphi %s899_s15, %s1233_s15  }
   0xf   : > { %s88_s23 = sadd.s32 1, %s851_s17  ;;  %p95_p0 = scmp.ne.s32.totalorder %s851_s17, %s847_s16 }
  0x10   : > { %p96_p1 = scmp.eq.s32.totalorder %s863_s20, 0  ;;  %p101_p2 = scmp.ne.s32.totalorder %s847_s16, %s843_s15 }
  0x11   : > { %p937_p3 = scmp.eq.s32.totalorder %s537_s21, 0  ;;  %p155_p4 = scmp.eq.s32.totalorder %s537_s21, 1 }
  0x12   : > { %p97_p5 = por %p96_p1, %p95_p0  ;;  %p161_p6 = scmp.eq.s32.totalorder %s538_s22, 1 }
  0x13   : > { %s1218_s24 = scalar_select %p937_p3, 1, 0 }
  0x14   : > { %p943_p7 = por %p937_p3, %p101_p2  ;;  %p947_p8 = por %p155_p4, %p95_p0 }
  0x15   : > { %p951_p9 = por %p161_p6, %p101_p2  ;;  %p539_p10 = scmp.ge.s32.totalorder %s863_s20, 1 }
  0x16   : > { %s1219_s25 = scalar_select %p943_p7, 1, 0 }
  0x17   : > { %s1220_s26 = scalar_select %p947_p8, 1, 0 }
  0x18   : > { %s1221_s27 = scalar_select %p951_p9, 1, 0 }
  0x19   : > { %p168_p11 = scmp.lt.s32.totalorder %s863_s20, 3  ;;  %p619_p1 = scmp.lt.s32.totalorder %s863_s20, 2 }
  0x1a   : > { %s1223_s1 = sld [smem:[#allocation18_spill]]  ;;  %s979_s8 = sand.u32 1, %s851_s17  }
  0x1b   : > { %p958_p13 = pnand %p539_p10, %p168_p11  ;;  %p968_p4 = pnand %p619_p1, %p97_p5 }
  0x1c   : > { %s37_s9 = sadd.s32 1, %s859_s19  ;;  %s1226_s0 = sld [smem:[#allocation17_spill]] }
  0x1d   : > { %p599_p0 = pneg %p958_p13 }
  0x1f   : > { %p974_p2 = pnand %p599_p0, %p937_p3 }
  0x20   : > { %s190_s5 = sshll.u32 %s1223_s1, 4  ;;  %s191_s5 = int_to_ptr.vmem [resolvable:$true] %s190_s5 }
  0x21   : > { %p683_p6 = pneg %p974_p2 }
  0x22   : > { %s681_s12 = scalar_lea.hbm %s1226_s0, 32 }
  0x23   : > { %p682_p5 = scmp.ne.s32.totalorder %s1226_s0, %s681_s12  ;;  %p688_p1 = scmp.lt.u32.totalorder %s681_s12, %s1226_s0 }
  0x25   : > { %p684_p10 = pnand %p683_p6, %p682_p5 }
  0x27   : > { %p685_p11 = pneg %p684_p10 }
  0x29   : > { %p690_p0 = pnand %p688_p1, %p685_p11 }
  0x2b   : > { %693 = shalt.err (!%p690_p0)
}
  0x2c   : > { %s865_s29 = smov [#allocation2]   ;;  %s694_s11 = scalar_lea.vmem %s191_s5, 16 }
  0x2d   : > { %602 = dma.hbm_to_smem (!%p974_p2), %s1226_s0, 32, %s865_s29, [#allocation5]  }
  0x2e   : > { %p695_p12 = scmp.ne.s32.totalorder %s191_s5, %s694_s11  ;;  %p702_p7 = scmp.lt.s32.totalorder %s191_s5, %s191_s5 }
  0x2f   : > { %p703_p5 = scmp.lt.s32.totalorder %s694_s11, %s694_s11 }
  0x30   : > { %p697_p9 = pnand %p695_p12, %p683_p6 }
  0x31   : > { %p704_p10 = por %p703_p5, %p702_p7 }
  0x32   : > { %p698_p8 = pneg %p697_p9 }
  0x34   : > { %p705_p3 = pnand %p704_p10, %p698_p8 }
  0x36   : > { %708 = shalt.err (!%p705_p3)
}
  0x37   : > { %s866_s13 = smov [#allocation7]   ;;  %p39_p11 = scmp.ge.s32.totalorder %s37_s9, 2 }
  0x38   : > { %605 = dma.vmem_to_smem (!%p974_p2), %s191_s5, 16, %s866_s13, [#allocation6]  }
  0x39   : > { %s543_s12 = sshll.u32 %s979_s8, 2  ;;  %s580_s14 = sshll.u32 %s859_s19, 6 }
  0x3a   : > { %s1239_s9 = smov (%p39_p11, %s37_s9), 0  ;;  %s1227_s2 = sld [smem:[#allocation19_spill]] }
  0x3b   : > { %s83_s7 = ssub.s32 %s859_s19, %s1239_s9  ;;  %s205_s30 = scalar_lea.vmem [#allocation8], %s543_s12 }
  0x3c   : > { %s213_s10 = sshll.u32 %s205_s30, 4  ;;  %p86_p3 = scmp.eq.s32.totalorder %s83_s7, 0  ;;  %s1011_s10 = int_to_ptr.vmem [resolvable:$true] %s213_s10 }
  0x3d   : > { %s202_s11 = scalar_lea.sflag [#allocation3], %s979_s8  ;;  %p711_p8 = pneg %p968_p4 }
  0x3e   : > { %s1016_s5 = scalar_select %p86_p3, %s851_s17, %s88_s23  }
  0x40   : > { %s1007_s29 = scalar_lea.hbm %s1227_s2, %s580_s14  ;;  %s714_s12 = scalar_lea.hbm %s1227_s2, 128 }
  0x41   : > { %s709_s13 = scalar_lea.hbm %s1007_s29, 64  ;;  %p715_p2 = scmp.lt.u32.totalorder %s1007_s29, %s1227_s2 }
  0x42   : > { %p710_p7 = scmp.ne.s32.totalorder %s1007_s29, %s709_s13  ;;  %p716_p6 = scmp.lt.u32.totalorder %s714_s12, %s709_s13 }
  0x43   : > { %p718_p0 = scmp.lt.u32.totalorder %s709_s13, %s1007_s29 }
  0x44   : > { %p712_p9 = pnand %p711_p8, %p710_p7  ;;  %p717_p1 = por %p716_p6, %p715_p2 }
  0x46   : > { %p713_p12 = pneg %p712_p9  ;;  %p719_p5 = por %p718_p0, %p717_p1 }
  0x48   : > { %p720_p10 = pnand %p719_p5, %p713_p12 }
  0x4a   : > { %723 = shalt.err (!%p720_p10)
}
  0x4b   : > { %s724_s23 = scalar_lea.vmem %s1011_s10, 64  ;;  %s867_s30 = smov [#allocation8]  }
  0x4c   : > { %p725_p11 = scmp.ne.s32.totalorder %s1011_s10, %s724_s23  ;;  %s729_s14 = sshll.u32 %s867_s30, 4  ;;  %s730_s14 = int_to_ptr.vmem [resolvable:$false] %s729_s14 }
  0x4d   : > { %s731_s21 = scalar_lea.vmem %s730_s14, 128  ;;  %p732_p9 = scmp.lt.s32.totalorder %s1011_s10, %s730_s14 }
  0x4e   : > { %p727_p3 = pnand %p725_p11, %p711_p8  ;;  %p733_p2 = scmp.lt.s32.totalorder %s731_s21, %s724_s23 }
  0x50   : > { %p728_p7 = pneg %p727_p3  ;;  %p734_p6 = por %p733_p2, %p732_p9 }
  0x52   : > { %p735_p1 = pnand %p734_p6, %p728_p7 }
  0x54   : > { %738 = shalt.err (!%p735_p1)
}
  0x55   : > { %s868_s13 = smov 32   ;;  %s869_s12 = smov 2  }
  0x56   : > { %609 = dma.hbm_to_vmem [thread:$0]  (!%p968_p4), %s1007_s29, 64, %s1011_s10, %s202_s11, %s868_s13, %s868_s13, %s869_s12  }
  0x57   : > { %s582_s22 = smul.u32 12, %s979_s8  ;;  %s224_s1 = scalar_lea.sflag [#allocation10], %s979_s8 }
  0x58   : > { %s583_s7 = smul.u32 192, %s859_s19  ;;  %s744_s11 = scalar_lea.hbm %s1209_s3, 384 }
  0x59   : > { %s227_s21 = scalar_lea.vmem [#allocation9], %s582_s22 }
  0x5a   : > { %s1054_s14 = scalar_lea.hbm %s1209_s3, %s583_s7  ;;  %s235_s0 = sshll.u32 %s227_s21, 4  ;;  %s1056_s0 = int_to_ptr.vmem [resolvable:$true] %s235_s0 }
  0x5b   : > { %s739_s2 = scalar_lea.hbm %s1054_s14, 192  ;;  %p745_p10 = scmp.lt.u32.totalorder %s1054_s14, %s1209_s3 }
  0x5c   : > { %p740_p12 = scmp.ne.s32.totalorder %s1054_s14, %s739_s2  ;;  %p746_p11 = scmp.lt.u32.totalorder %s744_s11, %s739_s2 }
  0x5d   : > { %p748_p7 = scmp.lt.u32.totalorder %s739_s2, %s1054_s14 }
  0x5e   : > { %p742_p0 = pnand %p740_p12, %p711_p8  ;;  %p747_p3 = por %p746_p11, %p745_p10 }
  0x60   : > { %p743_p5 = pneg %p742_p0  ;;  %p749_p9 = por %p748_p7, %p747_p3 }
  0x62   : > { %p750_p2 = pnand %p749_p9, %p743_p5 }
  0x64   : > { %753 = shalt.err (!%p750_p2)
}
  0x65   : > { %s754_s22 = scalar_lea.vmem %s1056_s0, 192  ;;  %s870_s30 = smov [#allocation9]  }
  0x66   : > { %p755_p6 = scmp.ne.s32.totalorder %s1056_s0, %s754_s22  ;;  %s759_s21 = sshll.u32 %s870_s30, 4  ;;  %s760_s21 = int_to_ptr.vmem [resolvable:$false] %s759_s21 }
  0x67   : > { %s761_s29 = scalar_lea.vmem %s760_s21, 384  ;;  %p762_p0 = scmp.lt.s32.totalorder %s1056_s0, %s760_s21 }
  0x68   : > { %p757_p1 = pnand %p755_p6, %p711_p8  ;;  %p763_p10 = scmp.lt.s32.totalorder %s761_s29, %s754_s22 }
  0x6a   : > { %p758_p12 = pneg %p757_p1  ;;  %p764_p11 = por %p763_p10, %p762_p0 }
  0x6c   : > { %p765_p3 = pnand %p764_p11, %p758_p12 }
  0x6e   : > { %768 = shalt.err (!%p765_p3)
}
  0x6f   : > { %612 = dma.hbm_to_vmem [thread:$0]  (!%p968_p4), %s1054_s14, 192, %s1056_s0, %s224_s1, %s868_s13, %s868_s13, %s869_s12  }
  0x70   : > { %247 = sbr.rel (%p958_p13) target bundleno = 187 (0xbb), region = 36  ;;  %p1228_p8 = scmp.ne.s32.totalorder (!%p958_p13), %s1218_s24, 0 }
  0x77   : > { %822 = dma.done.wait (%p1228_p8), [#allocation5], 32  }
  0x78   : > { %824 = vsyncadd (%p1228_p8), [#allocation5], 4294967264 }
  0x79   : > { %826 = dma.done.wait (%p1228_p8), [#allocation6], 16  }
  0x7a   : > { %828 = vsyncadd (%p1228_p8), [#allocation6], 4294967280  ;;  %s1098_s2 = sand.u32 1, %s847_s16   ;;  %p1229_p13 = scmp.ne.s32.totalorder %s1219_s25, 0 }
  0x7b   : > { %s550_s0 = sshll.u32 %s1098_s2, 2  ;;  %s258_s1 = scalar_lea.sflag [#allocation3], %s1098_s2 }
  0x7c   : > { %s261_s28 = scalar_lea.vmem [#allocation8], %s550_s0 }
  0x7d   : > { %830 = dma.done.wait (%p1229_p13), %s258_s1, 64  }
  0x7e   : > { %832 = vsyncadd (%p1229_p13), %s258_s1, 4294967232  ;;  %s584_s24 = smul.u32 12, %s1098_s2  ;;  %s267_s6 = scalar_lea.sflag [#allocation10], %s1098_s2 }
  0x80   : > { %s1110_s8 = scalar_lea.vmem [#allocation9], %s584_s24 }
  0x81   : > { %834 = dma.done.wait (%p1229_p13), %s267_s6, 192  }
  0x82   : > { %836 = vsyncadd (%p1229_p13), %s267_s6, 4294967104 }
  0x83   : > { %275 = sfence }
  0x84   : > { %s301_s13 = sld [smem:[#allocation2]]  ;;  %s552_s12 = sld [smem:[#allocation2 + $0x1]]  ;;  %v319_v0 = vld [vmem:[%s261_s28] sm:$0x3]  ;;  %v568_v1 = vld [vmem:[%s261_s28 + $0x2] sm:$0x3] }
  0x85   : > { %s553_s14 = sld [smem:[#allocation2 + $0x2]]  ;;  %s554_s10 = sld [smem:[#allocation2 + $0x3]]  ;;  %v322_v2 = vld [vmem:[%s1110_s8] sm:$0x3]  ;;  %v569_v4 = vld [vmem:[%s1110_s8 + $0x2] sm:$0x3] }
  0x86   : > { %s555_s11 = sld [smem:[#allocation2 + $0x4]]  ;;  %s1116_s7 = sld [smem:[#allocation2 + $0x5]]  ;;  %v570_v11 = vld [vmem:[%s1110_s8 + $0x4] sm:$0x3]  ;;  %v571_v13 = vld [vmem:[%s1110_s8 + $0x6] sm:$0x3] }
  0x87   : > { %s1118_s23 = sld [smem:[#allocation2 + $0x6]]  ;;  %s559_s22 = sld [smem:[#allocation2 + $0x80]]  ;;  %v572_v20 = vld [vmem:[%s1110_s8 + $0x8] sm:$0x3]  ;;  %v573_v29 = vld [vmem:[%s1110_s8 + $0xa] sm:$0x3] }
  0x88   : > { %s1121_s25 = sld [smem:[#allocation2 + $0x7]]  ;;  %s560_s30 = sld [smem:[#allocation2 + $0x81]] }
  0x89   : > { %s561_s21 = sld [smem:[#allocation2 + $0x82]]  ;;  %s1124_s29 = sld [smem:[#allocation2 + $0x83]] }
  0x8a   : > { %v333_v3 = vstv %s301_s13  ;;  %v335_v6 = vstv %s552_s12  ;;  %s1127_s1 = sld [smem:[#allocation2 + $0x84]]  ;;  %s1129_s28 = sld [smem:[#allocation2 + $0x85]] }
  0x8b   : > { %v334_v5 = vmul.f32 %v333_v3, %v319_v0  ;;  %v338_v7 = vstv %s553_s14  ;;  %v336_v8 = vmul.f32 %v568_v1, %v335_v6  ;;  %v341_v10 = vstv %s554_s10  ;;  %s1133_s24 = sld [smem:[#allocation2 + $0x86]]  ;;  %s1135_s6 = sld [smem:[#allocation7]] }
  0x8c   : > { %v339_v9 = vmul.f32 %v338_v7, %v322_v2  ;;  %v344_v12 = vstv %s555_s11  ;;  %v342_v15 = vmul.f32 %v569_v4, %v341_v10  ;;  %v347_v16 = vstv %s1116_s7  ;;  %s1139_s13 = sld [smem:[#allocation2 + $0x87]]  ;;  %s567_s12 = sld [smem:[#allocation7 + $0x1]] }
  0x8d   : > { %v337_v14 = vadd.f32 %v336_v8, %v334_v5  ;;  %v345_v18 = vmul.f32 %v570_v11, %v344_v12  ;;  %v360_v19 = vstv %s559_s22  ;;  %v348_v21 = vmul.f32 %v571_v13, %v347_v16  ;;  %s300_s8 = scalar_lea.vmem [#allocation11], %s550_s0  ;;  %s581_s10 = sshll.u32 %s855_s18, 6 }
  0x8e   : > { %v350_v22 = vstv %s1118_s23  ;;  %v361_v23 = vmul.f32 %v360_v19, %v319_v0  ;;  %v362_v24 = vstv %s560_s30  ;;  %v353_v30 = vstv %s1121_s25  ;;  %s403_s14 = sshll.u32 %s300_s8, 4  ;;  %s1157_s23 = scalar_lea.hbm %s1210_s4, %s581_s10  ;;  %s1152_s14 = int_to_ptr.vmem [resolvable:$true] %s403_s14 }
  0x8f   : > { %v340_v17 = vadd.f32 %v339_v9, %v337_v14  ;;  %v363_v26 = vmul.f32 %v568_v1, %v362_v24  ;;  %v365_v27 = vstv %s561_s21  ;;  %v368_v28 = vstv %s1124_s29  ;;  %s389_s22 = scalar_lea.sflag [#allocation4], %s1098_s2  ;;  %s769_s25 = scalar_lea.vmem %s1152_s14, 64 }
  0x90   : > { %v366_v31 = vmul.f32 %v365_v27, %v322_v2  ;;  %v371_v32 = vstv %s1127_s1  ;;  %v351_v34 = vmul.f32 %v572_v20, %v350_v22  ;;  %v369_v36 = vmul.f32 %v569_v4, %v368_v28  ;;  %p770_p4 = scmp.ne.s32.totalorder %s1152_s14, %s769_s25  ;;  %p1230_p5 = scmp.ne.s32.totalorder %s1220_s26, 0 }
  0x91   : > { %v343_v25 = vadd.f32 %v342_v15, %v340_v17  ;;  %v364_v35 = vadd.f32 %v363_v26, %v361_v23  ;;  %v374_v37 = vstv %s1129_s28  ;;  %v354_v39 = vmul.f32 %v573_v29, %v353_v30  ;;  %s871_s0 = smov [#allocation11]  }
  0x92   : > { %v372_v41 = vmul.f32 %v570_v11, %v371_v32  ;;  %v377_v42 = vstv %s1133_s24  ;;  %v375_v45 = vmul.f32 %v571_v13, %v374_v37  ;;  %v356_v46 = vstv %s1135_s6  ;;  %p771_p7 = pnand %p770_p4, %p1230_p5  ;;  %s773_s18 = sshll.u32 %s871_s0, 4  ;;  %s774_s18 = int_to_ptr.vmem [resolvable:$false] %s773_s18 }
  0x93   : > { %v346_v33 = vadd.f32 %v345_v18, %v343_v25  ;;  %v367_v40 = vadd.f32 %v366_v31, %v364_v35  ;;  %v380_v47 = vstv %s1139_s13  ;;  %v378_v50 = vmul.f32 %v572_v20, %v377_v42  ;;  %s775_s30 = scalar_lea.vmem %s774_s18, 128  ;;  %p776_p2 = scmp.lt.s32.totalorder %s1152_s14, %s774_s18 }
  0x94   : > { %v381_v53 = vmul.f32 %v573_v29, %v380_v47  ;;  %v383_v55 = vstv %s567_s12  ;;  %p772_p9 = pneg %p771_p7  ;;  %p777_p6 = scmp.lt.s32.totalorder %s775_s30, %s769_s25 }
  0x95   : > { %v349_v38 = vadd.f32 %v348_v21, %v346_v33  ;;  %v370_v44 = vadd.f32 %v369_v36, %v367_v40 }
  0x96   : > { %p778_p1 = por %p777_p6, %p776_p2 }
  0x97   : > { %v352_v43 = vadd.f32 %v351_v34, %v349_v38  ;;  %v373_v49 = vadd.f32 %v372_v41, %v370_v44 }
  0x98   : > { %p779_p12 = pnand %p778_p1, %p772_p9 }
  0x99   : > { %v355_v48 = vadd.f32 %v354_v39, %v352_v43  ;;  %v376_v52 = vadd.f32 %v375_v45, %v373_v49 }
  0x9b   : > { %v357_v51 = vadd.f32 %v356_v46, %v355_v48  ;;  %v379_v54 = vadd.f32 %v378_v50, %v376_v52 }
  0x9d   : > { %677 = vtanh.f32 %v357_v51  ;;  %v382_v56 = vadd.f32 %v381_v53, %v379_v54 }
  0x9f   : > { %v384_v57 = vadd.f32 %v383_v55, %v382_v56 }
  0xa1   : > { %679 = vtanh.f32 %v384_v57 }
  0xa7   : > { %v678_v58 = vpop.eup %677 }
  0xa8   : > { %359 = vst [vmem:[%s300_s8] sm:$0x3] %v678_v58 }
  0xab   : > { %v680_v59 = vpop.eup %679 }
  0xac   : > { %574 = vst [vmem:[%s300_s8 + $0x2] sm:$0x3] %v680_v59 }
  0xad   : > { %782 = shalt.err (!%p779_p12)
}
  0xae   : > { %s783_s21 = scalar_lea.hbm %s1157_s23, 64  ;;  %s787_s28 = scalar_lea.hbm %s1210_s4, 128 }
  0xaf   : > { %p784_p0 = scmp.ne.s32.totalorder %s1157_s23, %s783_s21  ;;  %p788_p3 = scmp.lt.u32.totalorder %s1157_s23, %s1210_s4 }
  0xb0   : > { %p789_p8 = scmp.lt.u32.totalorder %s787_s28, %s783_s21  ;;  %p791_p4 = scmp.lt.u32.totalorder %s783_s21, %s1157_s23 }
  0xb1   : > { %p785_p10 = pnand %p784_p0, %p1230_p5 }
  0xb2   : > { %p790_p13 = por %p789_p8, %p788_p3 }
  0xb3   : > { %p786_p11 = pneg %p785_p10 }
  0xb4   : > { %p792_p7 = por %p791_p4, %p790_p13 }
  0xb6   : > { %p793_p9 = pnand %p792_p7, %p786_p11 }
  0xb8   : > { %796 = shalt.err (!%p793_p9)
}
  0xb9   : > { %s872_s13 = smov 32   ;;  %s873_s12 = smov 2  }
  0xba   : > { %597 = dma.vmem_to_hbm [thread:$0]  (%p1230_p5), %s1152_s14, 64, %s1157_s23, %s389_s22, %s872_s13, %s872_s13, %s873_s12  }
  0xbb PF: > { %s418_s8 = sand.u32 1, %s843_s15   ;;  %p1231_p2 = scmp.ne.s32.totalorder %s1221_s27, 0 }
  0xbc   : > { %p1232_p6 = scmp.ge.s32.totalorder %s863_s20, 2  ;;  %s419_s10 = scalar_lea.sflag [#allocation4], %s418_s8 }
  0xbe   : > { %p614_p1 = pnand %p1232_p6, %p1231_p2 }
  0xc0   : > { %838 = dma.done.wait (!%p614_p1), %s419_s10, 64  }
  0xc1   : > { %840 = vsyncadd (!%p614_p1), %s419_s10, 4294967232  ;;  %s25_s20 = sadd.s32 1, %s863_s20   ;;  %s1233_s15 = smov %s847_s16 }
  0xc2   : > { %p22_p12 = scmp.ge.s32.totalorder %s25_s20, 4   ;;  %s1234_s16 = smov %s851_s17 }
  0xc3   : > { %s1235_s17 = smov %s1016_s5  ;;  %s1236_s18 = smov %s859_s19 }
  0xc4   : > { %s1237_s19 = smov %s1239_s9  ;;  %24 = sbr.rel (!%p22_p12) target bundleno = 14 (0xe), region = 111 }
  0xcb   :  { %424 = vsyncpa [#allocation3], 1 }
  0xcc   :  { %426 = vsyncpa [#allocation3 + $0x1], 1 }
  0xcd   :  { %427 = vsyncpa [#allocation10], 1 }
  0xce   :  { %429 = vsyncpa [#allocation10 + $0x1], 1 }
  0xcf   :  { %430 = vsyncpa [#allocation4], 1 }
  0xd0   :  { %432 = vsyncpa [#allocation4 + $0x1], 1 }
  0xd1   :  { %433 = vsyncpa [#allocation5], 1 }
  0xd2   :  { %435 = vsyncpa [#allocation5 + $0x1], 1 }
  0xd3   :  { %436 = vsyncpa [#allocation6], 1 }
  0xd4   :  { %438 = vsyncpa [#allocation6 + $0x1], 1 }

</bundles_post_ra>
